<compile_context>
chip_gen: v7x
topology: tpu7x:2x2x1
jax: 0.10.0
libtpu: 0.0.40
codegen_flags: <defaults>
</compile_context>

<pallas_src>
import functools

import jax
import jax.numpy as jnp
from jax.experimental import pallas as pl
from jax.experimental.pallas import tpu as pltpu

_LANE = 128


def _dilated_conv_relu_kernel(dilation, x_ref, xt_ref, w0_ref, w1_ref, o_ref):
    """One (batch, time-tile) grid step.

    x_ref : (Cin, NT)    main lane tile, input columns [j*NT, (j+1)*NT)
    xt_ref: (Cin, D128)  tail block, columns [(j+1)*NT, ...) (index clamped);
                         only its first `dilation` columns feed valid outputs.
    w0/w1 : (Cout, Cin)  conv taps k=0 / k=1
    o_ref : (Cout, NT)   lane-dense output tile
    """
    nt = o_ref.shape[-1]
    xl = x_ref[...]                                        # (Cin, NT)
    win = jnp.concatenate([xl, xt_ref[...]], axis=-1)      # lane-aligned concat
    xr = win[:, dilation:dilation + nt]                    # static lane shift (XLU)
    # f32 MXU matmuls: kernel is HBM-bound, so full f32 is free and keeps
    # exact parity with the f32 PyTorch layer (no bf16 downcast).
    y = jnp.dot(w0_ref[...], xl, preferred_element_type=jnp.float32)
    y = y + jnp.dot(w1_ref[...], xr, preferred_element_type=jnp.float32)
    o_ref[...] = jnp.maximum(y, 0.0).astype(o_ref.dtype)


def _vmem_budget_bytes():
    """Bytes allowed for one grid step's double-buffered blocks."""
    budget = 20 * 1024 * 1024
    try:
        budget = min(budget, int(pltpu.get_tpu_info().vmem_capacity_bytes) // 3)
    except Exception:
        pass
    return budget


def _num_tensorcores():
    """>1 only on multi-TensorCore chips (v7x); defaults to 1 if unknown."""
    try:
        return max(1, int(getattr(jax.devices()[0], "num_cores", 1) or 1))
    except Exception:
        return 1


def _pick_lane_tile(c_in, c_out, l_out, d128):
    """Largest lane tile (multiple of d128, hence of 128) whose double-buffered
    f32 blocks fit the VMEM budget, capped at 32768 lanes and at the problem."""
    budget = _vmem_budget_bytes()
    per_col = 2 * 4 * (c_in + c_out)                   # dbl-buffered f32 bytes / lane column
    fixed = 2 * 4 * (c_in * d128 + 2 * c_out * c_in)   # tail block + both weight taps
    nt = max(0, budget - fixed) // per_col
    nt = (nt // d128) * d128
    nt = min(nt, (32768 // d128) * d128)               # diminishing returns past ~32K lanes
    nt = min(nt, pl.cdiv(l_out, d128) * d128)          # no wider than the problem
    return max(nt, d128)


@functools.partial(jax.jit, static_argnames=("dilation",))
def dilated_conv_relu(x, weight, *, dilation):
    """x: (B, Cin, L) f32; weight: (Cout, Cin, 2) f32 (PyTorch Conv1d layout).
       returns (B, Cout, L - dilation) f32 == ReLU(dilated conv), bias-free."""
    B, Cin, L = x.shape
    Cout, Cin_w, K = weight.shape
    assert K == 2 and Cin_w == Cin and dilation >= 1
    Lout = L - dilation
    assert Lout >= 1

    D128 = _LANE * pl.cdiv(dilation, _LANE)            # tail block width (>= dilation)
    NT = _pick_lane_tile(Cin, Cout, Lout, D128)

    # Only multi-TC chips (v7x) benefit from forcing >=2 parallel grid steps;
    # on single-TC v5e/v6e extra steps are pure per-step overhead.
    ncores = _num_tensorcores()
    if ncores > 1:
        while NT > D128 and B * pl.cdiv(Lout, NT) < ncores:
            NT = max(D128, ((NT // 2) // D128) * D128)

    num_tiles = pl.cdiv(Lout, NT)
    ratio = NT // D128
    last_b = (L - 1) // D128   # last tail-block index whose DMA start is in range

    # Tiny one-time weight slices (per-tap matrices); no per-step cast work.
    w0 = weight[:, :, 0]
    w1 = weight[:, :, 1]

    block_bytes = 2 * 4 * ((Cin + Cout) * NT + Cin * D128 + 2 * Cout * Cin)
    vmem_limit = int(min(64 << 20, max(32 << 20, block_bytes + (8 << 20))))

    kernel = functools.partial(_dilated_conv_relu_kernel, dilation)

    return pl.pallas_call(
        kernel,
        out_shape=jax.ShapeDtypeStruct((B, Cout, Lout), x.dtype),
        grid_spec=pltpu.PrefetchScalarGridSpec(
            num_scalar_prefetch=0,
            grid=(B, num_tiles),
            in_specs=[
                # Main lane tile of x: columns [j*NT, (j+1)*NT)
                pl.BlockSpec((None, Cin, NT), lambda b, j: (b, 0, j)),
                # Narrow tail block of x: columns [(j+1)*NT, (j+1)*NT + D128),
                # clamped so the DMA start never leaves the array.
                pl.BlockSpec((None, Cin, D128),
                             lambda b, j: (b, 0, jnp.minimum((j + 1) * ratio, last_b))),
                pl.BlockSpec((Cout, Cin), lambda b, j: (0, 0)),
                pl.BlockSpec((Cout, Cin), lambda b, j: (0, 0)),
            ],
            out_specs=pl.BlockSpec((None, Cout, NT), lambda b, j: (b, 0, j)),
        ),
        compiler_params=pltpu.CompilerParams(
            dimension_semantics=("parallel", "parallel"),
            vmem_limit_bytes=vmem_limit,
        ),
    )(x, x, w0, w1)


def _reference(x, weight, dilation):
    # Pure-JAX reference matching the PyTorch forward; HIGHEST precision so the
    # reference itself is true f32 (XLA's default f32 dot may use bf16 passes).
    Lout = x.shape[-1] - dilation
    xl = x[:, :, :Lout]
    xr = x[:, :, dilation:dilation + Lout]
    y = (jnp.einsum("oc,bcl->bol", weight[:, :, 0], xl,
                    precision=jax.lax.Precision.HIGHEST)
         + jnp.einsum("oc,bcl->bol", weight[:, :, 1], xr,
                      precision=jax.lax.Precision.HIGHEST))
    return jnp.maximum(y, 0.0)


if __name__ == "__main__":
    # Small deterministic example: B=2, C=8 channels, L=260 timesteps, dilation=4.
    B, C, L, DIL = 2, 8, 260, 4

    key = jax.random.PRNGKey(0)
    kx, kw = jax.random.split(key)
    x = jax.random.normal(kx, (B, C, L), dtype=jnp.float32)
    # Kaiming-uniform-like init for Conv1d weight (fan_in = Cin * kernel_size).
    bound = 1.0 / jnp.sqrt(jnp.asarray(C * 2, jnp.float32))
    w = jax.random.uniform(kw, (C, C, 2), jnp.float32, minval=-bound, maxval=bound)

    out = dilated_conv_relu(x, w, dilation=DIL)
    jax.block_until_ready(out)

    ref = _reference(x, w, DIL)
    assert out.shape == (B, C, L - DIL)
    # f32 everywhere (kernel and reference) => tight tolerance.
    max_err = float(jnp.max(jnp.abs(out - ref)))
    assert jnp.allclose(out, ref, atol=1e-5, rtol=1e-5), max_err

    print("KERNEL_OK")
</pallas_src>

<mosaic_0001>
module attributes {stable_mosaic.version = 11 : i64} {
  func.func @_dilated_conv_relu_kernel(%arg0: i32, %arg1: i32, %arg2: memref<1x8x256xf32, #tpu.memory_space<vmem>>, %arg3: memref<1x8x128xf32, #tpu.memory_space<vmem>>, %arg4: memref<8x8xf32, #tpu.memory_space<vmem>>, %arg5: memref<8x8xf32, #tpu.memory_space<vmem>>, %arg6: memref<1x8x256xf32, #tpu.memory_space<vmem>>) attributes {dimension_semantics = [#tpu.dimension_semantics<parallel>, #tpu.dimension_semantics<parallel>], iteration_bounds = array<i64: 2, 1>, scalar_prefetch = 0 : i64, scratch_operands = 0 : i64, tpu.core_type = #tpu.core_type<tc>, window_params = [{transform_indices = @transform_0, window_bounds = array<i64: 1, 8, 256>}, {transform_indices = @transform_1, window_bounds = array<i64: 1, 8, 128>}, {pipeline_mode = #tpu.pipeline_mode<synchronous>, transform_indices = @transform_2, window_bounds = array<i64: 8, 8>}, {pipeline_mode = #tpu.pipeline_mode<synchronous>, transform_indices = @transform_3, window_bounds = array<i64: 8, 8>}, {transform_indices = @transform_4, window_bounds = array<i64: 1, 8, 256>}]} {
    %c0 = arith.constant 0 : index
    %c0_0 = arith.constant 0 : index
    %c0_1 = arith.constant 0 : index
    %0 = vector.load %arg2[%c0, %c0_0, %c0_1] : memref<1x8x256xf32, #tpu.memory_space<vmem>>, vector<1x8x256xf32>
    %1 = vector.shape_cast %0 : vector<1x8x256xf32> to vector<8x256xf32>
    %c0_2 = arith.constant 0 : index
    %c0_3 = arith.constant 0 : index
    %c0_4 = arith.constant 0 : index
    %2 = vector.load %arg3[%c0_2, %c0_3, %c0_4] : memref<1x8x128xf32, #tpu.memory_space<vmem>>, vector<1x8x128xf32>
    %3 = vector.shape_cast %2 : vector<1x8x128xf32> to vector<8x128xf32>
    %4 = tpu.concatenate %1, %3 in 1 : vector<8x256xf32>, vector<8x128xf32> -> vector<8x384xf32>
    %5 = vector.extract_strided_slice %4 {offsets = [0, 4], sizes = [8, 256], strides = [1, 1]} : vector<8x384xf32> to vector<8x256xf32>
    %c0_5 = arith.constant 0 : index
    %c0_6 = arith.constant 0 : index
    %6 = vector.load %arg4[%c0_5, %c0_6] : memref<8x8xf32, #tpu.memory_space<vmem>>, vector<8x8xf32>
    %cst = arith.constant dense<0.000000e+00> : vector<8x256xf32>
    %7 = tpu.matmul %6, %1, %cst {dimension_numbers = #tpu.dot_dimension_numbers<[1], [0], [0], [1], [0, 0, 1, 1], [], []>} : vector<8x8xf32>, vector<8x256xf32>, vector<8x256xf32> -> vector<8x256xf32>
    %c0_7 = arith.constant 0 : index
    %c0_8 = arith.constant 0 : index
    %8 = vector.load %arg5[%c0_7, %c0_8] : memref<8x8xf32, #tpu.memory_space<vmem>>, vector<8x8xf32>
    %cst_9 = arith.constant dense<0.000000e+00> : vector<8x256xf32>
    %9 = tpu.matmul %8, %5, %cst_9 {dimension_numbers = #tpu.dot_dimension_numbers<[1], [0], [0], [1], [0, 0, 1, 1], [], []>} : vector<8x8xf32>, vector<8x256xf32>, vector<8x256xf32> -> vector<8x256xf32>
    %10 = arith.addf %7, %9 : vector<8x256xf32>
    %cst_10 = arith.constant 0.000000e+00 : f32
    %11 = vector.broadcast %cst_10 : f32 to vector<8x256xf32>
    %12 = arith.maximumf %10, %11 : vector<8x256xf32>
    %c0_11 = arith.constant 0 : index
    %c0_12 = arith.constant 0 : index
    %c0_13 = arith.constant 0 : index
    %13 = vector.load %arg6[%c0_11, %c0_12, %c0_13] : memref<1x8x256xf32, #tpu.memory_space<vmem>>, vector<1x8x256xf32>
    %14 = vector.shape_cast %13 : vector<1x8x256xf32> to vector<8x256xf32>
    %15 = vector.shape_cast %12 : vector<8x256xf32> to vector<1x8x256xf32>
    tpu.vector_store %arg6[%c0_11, %c0_12, %c0_13], %15 {strides = array<i32>} : memref<1x8x256xf32, #tpu.memory_space<vmem>>, vector<1x8x256xf32>,
    return
  }
  func.func @transform_0(%arg0: i32, %arg1: i32) -> (i32, i32, i32) {
    %c0_i32 = arith.constant 0 : i32
    %c0_i32_0 = arith.constant 0 : i32
    return %arg0, %c0_i32, %arg1 : i32, i32, i32
  }
  func.func @transform_1(%arg0: i32, %arg1: i32) -> (i32, i32, i32) {
    %c1_i32 = arith.constant 1 : i32
    %0 = arith.addi %arg1, %c1_i32 : i32
    %c2_i32 = arith.constant 2 : i32
    %1 = arith.muli %0, %c2_i32 : i32
    %c2_i32_0 = arith.constant 2 : i32
    %2 = arith.minsi %1, %c2_i32_0 : i32
    %c0_i32 = arith.constant 0 : i32
    %c0_i32_1 = arith.constant 0 : i32
    return %arg0, %c0_i32, %2 : i32, i32, i32
  }
  func.func @transform_2(%arg0: i32, %arg1: i32) -> (i32, i32) {
    %c0_i32 = arith.constant 0 : i32
    %c0_i32_0 = arith.constant 0 : i32
    %c0_i32_1 = arith.constant 0 : i32
    return %c0_i32, %c0_i32_0 : i32, i32
  }
  func.func @transform_3(%arg0: i32, %arg1: i32) -> (i32, i32) {
    %c0_i32 = arith.constant 0 : i32
    %c0_i32_0 = arith.constant 0 : i32
    %c0_i32_1 = arith.constant 0 : i32
    return %c0_i32, %c0_i32_0 : i32, i32
  }
  func.func @transform_4(%arg0: i32, %arg1: i32) -> (i32, i32, i32) {
    %c0_i32 = arith.constant 0 : i32
    %c0_i32_0 = arith.constant 0 : i32
    return %arg0, %c0_i32, %arg1 : i32, i32, i32
  }
}

</mosaic_0001>

<bundles_post_ra>
// kernel: dilated_conv_relu.1
= control target key start
LH: loop header
LB: loop body
LE: loop exit
PB: predicated region body
PF: predicated region fallthrough
CT: control target
= control target key end

     0   :  { %9 = vsyncpa [#allocation3], 0  ;;  %s1097_s0 = inlined_call_operand.hbm [shape: f32[2,8,260], index: 0, kind: input, shape index: {}, may-alias: {0,1}]   ;;  %s1098_s1 = inlined_call_operand.hbm [shape: f32[2,8,260], index: 1, kind: input, shape index: {}, may-alias: {0,1}]   ;;  %s1099_s2 = inlined_call_operand.vmem [shape: f32[8,8], index: 2, kind: input, shape index: {}]   ;;  %s1100_s3 = inlined_call_operand.vmem [shape: f32[8,8], index: 3, kind: input, shape index: {}]   ;;  %s1101_s4 = inlined_call_operand.hbm [shape: f32[2,8,256], index: 4, kind: output, shape index: {}]  }
   0x1   :  { %11 = vsyncpa [#allocation3 + $0x1], 0 }
   0x2   :  { %12 = vsyncpa [#allocation6], 0 }
   0x3   :  { %14 = vsyncpa [#allocation6 + $0x1], 0 }
   0x4   :  { %15 = vsyncpa [#allocation4], 0 }
   0x5   :  { %17 = vsyncpa [#allocation4 + $0x1], 0  ;;  %s873_s15 = smov 0   ;;  %s875_s16 = smov 0  }
   0x6   :  { %s877_s17 = smov 0   ;;  %s879_s18 = smov 0  }
   0x7   :  { %s881_s19 = smov 0   ;;  %s883_s20 = smov 0  }
   0x8 LB: > { %s599_s21 = sadd.s32 4294967295, %s841_s20   ;;  %s600_s22 = sadd.s32 4294967294, %s841_s20   ;;  %s841_s20 = sphi %s883_s20, %s23_s20   ;;  %s837_s19 = sphi %s881_s19, %s1119_s19   ;;  %s833_s18 = sphi %s879_s18, %s1118_s18   ;;  %s829_s17 = sphi %s877_s17, %s1117_s17   ;;  %s825_s16 = sphi %s875_s16, %s1116_s16   ;;  %s821_s15 = sphi %s873_s15, %s1115_s15  }
   0x9   : > { %s35_s23 = sadd.s32 1, %s837_s19  ;;  %s44_s24 = sadd.s32 1, %s829_s17 }
   0xa   : > { %p37_p0 = scmp.ge.s32.totalorder %s35_s23, 2  ;;  %p51_p1 = scmp.ne.s32.totalorder %s829_s17, %s825_s16 }
   0xb   : > { %p52_p2 = scmp.eq.s32.totalorder %s841_s20, 0  ;;  %p57_p3 = scmp.ne.s32.totalorder %s825_s16, %s821_s15 }
   0xc   : > { %s1121_s23 = smov (%p37_p0, %s35_s23), 0  ;;  %p58_p5 = scmp.eq.s32.totalorder %s599_s21, 0 }
   0xd   : > { %p914_p4 = por %p52_p2, %p51_p1  ;;  %s39_s26 = ssub.s32 %s837_s19, %s1121_s23 }
   0xe   : > { %p161_p6 = scmp.eq.s32.totalorder %s599_s21, 1  ;;  %p42_p7 = scmp.eq.s32.totalorder %s39_s26, 0 }
   0xf   : > { %p920_p8 = por %p58_p5, %p57_p3  ;;  %p167_p10 = scmp.eq.s32.totalorder %s600_s22, 1 }
  0x10   : > { %p924_p9 = por %p161_p6, %p51_p1  ;;  %p642_p13 = scmp.lt.s32.totalorder %s841_s20, 2 }
  0x11   : > { %s1105_s27 = scalar_select %p920_p8, 1, 0 }
  0x12   : > { %s1106_s28 = scalar_select %p924_p9, 1, 0 }
  0x13   : > { %s929_s29 = scalar_select %p42_p7, %s829_s17, %s44_s24  }
  0x14   : > { %p931_p11 = por %p167_p10, %p57_p3  ;;  %s938_s5 = sand.u32 1, %s829_s17  }
  0x15   : > { %s603_s6 = sshll.u32 %s938_s5, 4  ;;  %s623_s7 = smul.u32 384, %s837_s19 }
  0x16   : > { %s1107_s30 = scalar_select %p931_p11, 1, 0 }
  0x17   : > { %s197_s8 = scalar_lea.vmem [#allocation2], %s603_s6  ;;  %p944_p0 = pnand %p642_p13, %p914_p4 }
  0x18   : > { %s213_s9 = sshll.u32 %s197_s8, 4  ;;  %s953_s13 = scalar_lea.hbm %s1097_s0, %s623_s7  ;;  %s955_s9 = int_to_ptr.vmem [resolvable:$true] %s213_s9 }
  0x19   : > { %s194_s14 = scalar_lea.sflag [#allocation3], %s938_s5  ;;  %s695_s21 = scalar_lea.hbm %s953_s13, 256 }
  0x1a   : > { %p696_p1 = scmp.ne.s32.totalorder %s953_s13, %s695_s21  ;;  %p697_p2 = pneg %p944_p0 }
  0x1b   : > { %s700_s25 = scalar_lea.hbm %s1097_s0, 768  ;;  %p701_p5 = scmp.lt.u32.totalorder %s953_s13, %s1097_s0 }
  0x1c   : > { %p698_p3 = pnand %p697_p2, %p696_p1  ;;  %p702_p6 = scmp.lt.u32.totalorder %s700_s25, %s695_s21 }
  0x1d   : > { %p704_p10 = scmp.lt.u32.totalorder %s695_s21, %s953_s13 }
  0x1e   : > { %p699_p4 = pneg %p698_p3  ;;  %p703_p7 = por %p702_p6, %p701_p5 }
  0x20   : > { %p705_p13 = por %p704_p10, %p703_p7 }
  0x22   : > { %p706_p12 = pnand %p705_p13, %p699_p4 }
  0x24   : > { %709 = shalt.err (!%p706_p12)
}
  0x25   : > { %s710_s8 = scalar_lea.vmem %s955_s9, 256  ;;  %s843_s11 = smov [#allocation2]  }
  0x26   : > { %p711_p1 = scmp.ne.s32.totalorder %s955_s9, %s710_s8  ;;  %s715_s12 = sshll.u32 %s843_s11, 4  ;;  %s716_s12 = int_to_ptr.vmem [resolvable:$false] %s715_s12 }
  0x27   : > { %s717_s22 = scalar_lea.vmem %s716_s12, 512  ;;  %p718_p9 = scmp.lt.s32.totalorder %s955_s9, %s716_s12 }
  0x28   : > { %p713_p3 = pnand %p711_p1, %p697_p2  ;;  %p719_p5 = scmp.lt.s32.totalorder %s717_s22, %s710_s8 }
  0x2a   : > { %p714_p11 = pneg %p713_p3  ;;  %p720_p6 = por %p719_p5, %p718_p9 }
  0x2c   : > { %p721_p7 = pnand %p720_p6, %p714_p11 }
  0x2e   : > { %724 = shalt.err (!%p721_p7)
}
  0x2f   : > { %634 = dma.hbm_to_vmem [thread:$0]  (!%p944_p0), %s953_s13, 256, %s955_s9, %s194_s14  }
  0x30   : > { %p607_p12 = scmp.ge.s32.totalorder %s841_s20, 1  ;;  %p242_p4 = scmp.lt.s32.totalorder %s841_s20, 3 }
  0x31   : > { %s605_s21 = sshll.u32 %s938_s5, 3  ;;  %s619_s25 = sadd.s32 256, %s623_s7 }
  0x32   : > { %p986_p10 = pnand %p607_p12, %p242_p4  ;;  %s224_s26 = scalar_lea.vmem [#allocation5], %s605_s21 }
  0x33   : > { %s237_s6 = sshll.u32 %s224_s26, 4  ;;  %s995_s12 = scalar_lea.hbm %s1098_s1, %s619_s25  ;;  %s238_s6 = int_to_ptr.vmem [resolvable:$true] %s237_s6 }
  0x34   : > { %s1109_s24 = scalar_select %p986_p10, 1, 0 }
  0x35   : > { %s221_s9 = scalar_lea.sflag [#allocation6], %s938_s5  ;;  %s725_s13 = scalar_lea.hbm %s995_s12, 128 }
  0x36   : > { %p726_p9 = scmp.ne.s32.totalorder %s995_s12, %s725_s13  ;;  %s730_s22 = scalar_lea.hbm %s1098_s1, 768 }
  0x37   : > { %p731_p1 = scmp.lt.u32.totalorder %s995_s12, %s1098_s1  ;;  %p732_p3 = scmp.lt.u32.totalorder %s730_s22, %s725_s13 }
  0x38   : > { %p728_p11 = pnand %p726_p9, %p697_p2  ;;  %p734_p6 = scmp.lt.u32.totalorder %s725_s13, %s995_s12 }
  0x39   : > { %p733_p5 = por %p732_p3, %p731_p1 }
  0x3a   : > { %p729_p13 = pneg %p728_p11 }
  0x3b   : > { %p735_p7 = por %p734_p6, %p733_p5 }
  0x3d   : > { %p736_p12 = pnand %p735_p7, %p729_p13 }
  0x3f   : > { %739 = shalt.err (!%p736_p12)
}
  0x40   : > { %s740_s5 = scalar_lea.vmem %s238_s6, 128  ;;  %s844_s25 = smov [#allocation5]  }
  0x41   : > { %p741_p4 = scmp.ne.s32.totalorder %s238_s6, %s740_s5  ;;  %s745_s8 = sshll.u32 %s844_s25, 4  ;;  %s746_s8 = int_to_ptr.vmem [resolvable:$false] %s745_s8 }
  0x42   : > { %s747_s11 = scalar_lea.vmem %s746_s8, 256  ;;  %p748_p8 = scmp.lt.s32.totalorder %s238_s6, %s746_s8 }
  0x43   : > { %p743_p9 = pnand %p741_p4, %p697_p2  ;;  %p749_p10 = scmp.lt.s32.totalorder %s747_s11, %s740_s5 }
  0x45   : > { %p744_p11 = pneg %p743_p9  ;;  %p750_p1 = por %p749_p10, %p748_p8 }
  0x47   : > { %p751_p3 = pnand %p750_p1, %p744_p11 }
  0x49   : > { %754 = shalt.err (!%p751_p3)
}
  0x4a   : > { %637 = dma.hbm_to_vmem [thread:$0]  (!%p944_p0), %s995_s12, 128, %s238_s6, %s221_s9  }
  0x4b   : > { %p1110_p13 = scmp.ne.s32.totalorder %s1109_s24, 0 }
  0x4c   : > { %s1020_s13 = sand.u32 (!%p1110_p13), 1, %s825_s16   ;;  %p1111_p8 = scmp.ne.s32.totalorder (!%p1110_p13), %s1105_s27, 0 }
  0x4d   : > { %246 = sbr.rel (%p1110_p13) target bundleno = 443 (0x1bb), region = 36  ;;  %s608_s7 = sshll.u32 (!%p1110_p13), %s1020_s13, 4 }
  0x4e   : > { %s249_s14 = scalar_lea.sflag (!%p1110_p13), [#allocation3], %s1020_s13  ;;  %s252_s22 = scalar_lea.vmem (!%p1110_p13), [#allocation2], %s608_s7 }
  0x54   : > { %808 = dma.done.wait (%p1111_p8), %s249_s14, 256  }
  0x55   : > { %810 = vsyncadd (%p1111_p8), %s249_s14, 4294967040  ;;  %s609_s10 = sshll.u32 %s1020_s13, 3  ;;  %s258_s24 = scalar_lea.sflag [#allocation6], %s1020_s13 }
  0x56   : > { %s261_s6 = scalar_lea.vmem [#allocation5], %s609_s10 }
  0x57   : > { %812 = dma.done.wait (%p1111_p8), %s258_s24, 128  }
  0x58   : > { %814 = vsyncadd (%p1111_p8), %s258_s24, 4294967168  ;;  %v845_v0 = vmov 0.0   ;;  %v302_v1 = vld [vmem:[%s252_s22 + $0x8] sm:$0xff]  ;;  %v301_v2 = vld [vmem:[%s252_s22] sm:$0xff]  ;;  %s846_s12 = smov 124   ;;  %vm320_vm0 = vcmask 64512  }
  0x59   : > { %462 = vmatprep.mubr.f32.mxu0 %v845_v0  ;;  %388 = vmatprep.mubr.f32.mxu1 %v845_v0  ;;  %v304_v3 = vld [vmem:[%s1099_s2] sm:$0xff]  ;;  %vm315_vm1 = vcmask 1014784   ;;  %s620_s5 = sshll.u32 %s833_s18, 8  ;;  %s290_s25 = scalar_lea.vmem [#allocation7], %s608_s7 }
  0x5a   : > { %311 = vrot.lane.b32.xlu0 %v302_v1, %s846_s12  ;;  %309 = vrot.lane.b32.xlu1 %v301_v2, %s846_s12  ;;  %v303_v4 = vld [vmem:[%s261_s6] sm:$0xff]  ;;  %s490_s8 = sshll.u32 %s290_s25, 4  ;;  %s1048_s22 = scalar_lea.hbm %s1101_s4, %s620_s5  ;;  %s1050_s8 = int_to_ptr.vmem [resolvable:$true] %s490_s8 }
  0x5b   : > { %398 = vmatprep.subr.mxu0 %v302_v1  ;;  %v305_v9 = vld [vmem:[%s1100_s3] sm:$0xff]  ;;  %s474_s10 = scalar_lea.sflag [#allocation4], %s1020_s13  ;;  %s755_s18 = scalar_lea.vmem %s1050_s8, 256 }
  0x5c   : > { %399 = vmatpush1.msra.mxu0 %v301_v2  ;;  %p756_p0 = scmp.ne.s32.totalorder %s1050_s8, %s755_s18  ;;  %p1112_p2 = scmp.ne.s32.totalorder %s1106_s28, 0 }
  0x5d   : > { %612 = vmatmul.mubr.msk.f32.vlgmr.msra.gmra.mrb[0].mxu0 %vm320_vm0, %v304_v3  ;;  %s847_s7 = smov [#allocation7]  }
  0x5e   : > { %313 = vrot.lane.b32.xlu0 %v303_v4, %s846_s12  ;;  %p757_p10 = pnand %p756_p0, %p1112_p2  ;;  %s759_s24 = sshll.u32 %s847_s7, 4  ;;  %s760_s24 = int_to_ptr.vmem [resolvable:$false] %s759_s24 }
  0x5f   : > { %s761_s6 = scalar_lea.vmem %s760_s24, 512  ;;  %p762_p6 = scmp.lt.s32.totalorder %s1050_s8, %s760_s24 }
  0x60   : > { %p758_p5 = pneg %p757_p10  ;;  %p763_p7 = scmp.lt.s32.totalorder %s761_s6, %s755_s18 }
  0x62   : > { %p764_p12 = por %p763_p7, %p762_p6 }
  0x64   : > { %p765_p4 = pnand %p764_p12, %p758_p5 }
  0xcc   : > { %v312_v5 = vpop.permute.xlu0 %311  ;;  %v310_v6 = vpop.permute.xlu1 %309 }
  0xcd   : > { %v316_v10 = vsel %vm315_vm1, %v310_v6, %v312_v5 }
  0xd0   : > { %v314_v7 = vpop.permute.xlu0 %313 }
  0xd1   : > { %v317_v8 = vsel %vm315_vm1, %v312_v5, %v314_v7 }
  0xd2   : > { %324 = vmatprep.subr.mxu1 %v317_v8 }
  0xd3   : > { %325 = vmatpush1.msra.mxu1 %v316_v10 }
  0xd4   : > { %611 = vmatmul.mubr.msk.f32.vlgmr.msra.gmra.mrb[0].mxu1 %vm320_vm0, %v305_v9 }
 0x130   : > { %v464_v11 = vpop.f32.mrb[0].mxu0 }
 0x131   : > { %v466_v12 = vpop.f32.mrb[1].mxu0 }
 0x1a7   : > { %v390_v13 = vpop.f32.mrb[0].mxu1 }
 0x1a8   : > { %v465_v14 = vadd.f32 %v464_v11, %v390_v13  ;;  %v392_v15 = vpop.f32.mrb[1].mxu1 }
 0x1a9   : > { %v467_v16 = vadd.f32 %v466_v12, %v392_v15 }
 0x1aa   : > { %v469_v17 = vmax.f32 %v465_v14, 0.0 }
 0x1ab   : > { %v470_v18 = vmax.f32 %v467_v16, 0.0 }
 0x1ac   : > { %471 = vst [vmem:[%s290_s25] sm:$0xff] %v469_v17 }
 0x1ad   : > { %472 = vst [vmem:[%s290_s25 + $0x8] sm:$0xff] %v470_v18 }
 0x1ae   : > { %768 = shalt.err (!%p765_p4)
}
 0x1af   : > { %s769_s13 = scalar_lea.hbm %s1048_s22, 256  ;;  %s773_s21 = scalar_lea.hbm %s1101_s4, 512 }
 0x1b0   : > { %p770_p9 = scmp.ne.s32.totalorder %s1048_s22, %s769_s13  ;;  %p774_p3 = scmp.lt.u32.totalorder %s1048_s22, %s1101_s4 }
 0x1b1   : > { %p775_p13 = scmp.lt.u32.totalorder %s773_s21, %s769_s13  ;;  %p777_p0 = scmp.lt.u32.totalorder %s769_s13, %s1048_s22 }
 0x1b2   : > { %p771_p11 = pnand %p770_p9, %p1112_p2 }
 0x1b3   : > { %p776_p8 = por %p775_p13, %p774_p3 }
 0x1b4   : > { %p772_p1 = pneg %p771_p11 }
 0x1b5   : > { %p778_p10 = por %p777_p0, %p776_p8 }
 0x1b7   : > { %p779_p5 = pnand %p778_p10, %p772_p1 }
 0x1b9   : > { %782 = shalt.err (!%p779_p5)
}
 0x1ba   : > { %629 = dma.vmem_to_hbm [thread:$0]  (%p1112_p2), %s1050_s8, 256, %s1048_s22, %s474_s10  }
 0x1bb PF: > { %s502_s5 = sand.u32 1, %s821_s15   ;;  %p1113_p6 = scmp.ne.s32.totalorder %s1107_s30, 0 }
 0x1bc   : > { %p1114_p7 = scmp.ge.s32.totalorder %s841_s20, 2  ;;  %s503_s25 = scalar_lea.sflag [#allocation4], %s502_s5 }
 0x1be   : > { %p639_p12 = pnand %p1114_p7, %p1113_p6 }
 0x1c0   : > { %816 = dma.done.wait (!%p639_p12), %s503_s25, 256  }
 0x1c1   : > { %818 = vsyncadd (!%p639_p12), %s503_s25, 4294967040  ;;  %s23_s20 = sadd.s32 1, %s841_s20   ;;  %s1115_s15 = smov %s825_s16 }
 0x1c2   : > { %p20_p4 = scmp.ge.s32.totalorder %s23_s20, 4   ;;  %s1116_s16 = smov %s829_s17 }
 0x1c3   : > { %s1117_s17 = smov %s929_s29  ;;  %s1118_s18 = smov %s837_s19 }
 0x1c4   : > { %s1119_s19 = smov %s1121_s23  ;;  %22 = sbr.rel (!%p20_p4) target bundleno = 8 (0x8), region = 94 }
 0x1cb   :  { %508 = vsyncpa [#allocation3], 1 }
 0x1cc   :  { %510 = vsyncpa [#allocation3 + $0x1], 1 }
 0x1cd   :  { %511 = vsyncpa [#allocation6], 1 }
 0x1ce   :  { %513 = vsyncpa [#allocation6 + $0x1], 1 }
 0x1cf   :  { %514 = vsyncpa [#allocation4], 1 }
 0x1d0   :  { %516 = vsyncpa [#allocation4 + $0x1], 1 }

</bundles_post_ra>
